<compile_context>
chip_gen: v6e
topology: v6e:2x2x1
jax: 0.10.0
libtpu: 0.0.40
codegen_flags: <defaults>
</compile_context>

<pallas_src>
import math
from functools import partial

import jax
import jax.numpy as jnp
from jax.experimental import pallas as pl
from jax.experimental.pallas import tpu as pltpu


def cross_attention_kernel(x_ref, y_ref, wq_ref, wkv_ref, wo_ref, bo_ref, o_ref,
                           *, num_heads, head_size, all_head, attn_mxu_dtype):
    # One (batch, Sx-tile) element per grid step, everything resident in VMEM.
    x = x_ref[0]                       # (bSx, D)
    y = y_ref[0]                       # (Sy, D)

    # --- Projections: one MXU matmul for Q, one fused matmul for [K | V]. ---
    q = jnp.dot(x, wq_ref[...], preferred_element_type=jnp.float32)     # (bSx, A)
    kv = jnp.dot(y, wkv_ref[...], preferred_element_type=jnp.float32)   # (Sy, 2A)
    k = kv[:, :all_head]                                                 # (Sy, A)
    v = kv[:, all_head:]                                                 # (Sy, A)

    # Fold the 1/sqrt(head_size) softmax scale into Q once
    # (Sx*A multiplies instead of H*Sx*Sy score multiplies).
    q = q * (1.0 / math.sqrt(head_size))

    bsx = q.shape[0]
    sy = k.shape[0]

    # --- Head-batched attention: (H, S, h) layout, batched MXU matmuls, ---
    # --- no per-head loop, no lane-granularity slicing, no concatenate.  ---
    qh = pltpu.einshape("qhd->hqd", q.reshape(bsx, num_heads, head_size))  # (H,bSx,h)
    kh = pltpu.einshape("khd->hkd", k.reshape(sy, num_heads, head_size))   # (H,Sy,h)
    vh = pltpu.einshape("khd->hkd", v.reshape(sy, num_heads, head_size))   # (H,Sy,h)

    # bf16 at the MXU boundary, f32 accumulation; softmax elementwise stays f32.
    s = jnp.einsum("hqd,hkd->hqk",
                   qh.astype(attn_mxu_dtype), kh.astype(attn_mxu_dtype),
                   preferred_element_type=jnp.float32)                   # (H,bSx,Sy)
    s = s - jnp.max(s, axis=-1, keepdims=True)
    p = jnp.exp(s)
    p = p * pl.reciprocal(jnp.sum(p, axis=-1, keepdims=True), approx=True)

    ctx = jnp.einsum("hqk,hkd->hqd",
                     p.astype(attn_mxu_dtype), vh.astype(attn_mxu_dtype),
                     preferred_element_type=jnp.float32)                 # (H,bSx,h)
    ctx = pltpu.einshape("hqd->qhd", ctx).reshape(bsx, num_heads * head_size)

    # --- Output projection (+ bias), lane-dense full-D store. ---
    out = jnp.dot(ctx, wo_ref[...], preferred_element_type=jnp.float32) + bo_ref[...]
    o_ref[0] = out.astype(o_ref.dtype)


def cross_attention(x, y, wq_t, wk_t, wv_t, wo_t, bo, *, num_heads,
                    block_sx=256, attn_mxu_dtype=jnp.bfloat16):
    """x: (B, Sx, hidden), y: (B, Sy, hidden); w*_t are (in, out) transposed weights."""
    B, Sx, D = x.shape
    _, Sy, _ = y.shape
    A = wq_t.shape[1]
    assert A % num_heads == 0
    head_size = A // num_heads

    bo2 = bo.reshape(1, D)
    # Fused K/V projection weight: one (D, 2A) matmul on y instead of two.
    wkv_t = jnp.concatenate([wk_t, wv_t], axis=1)

    # Sx tile size: full seq if small, otherwise a multiple of 8 (sublane rule).
    bsx = min(block_sx, Sx)
    if bsx != Sx and bsx % 8 != 0:
        bsx = max(8, (bsx // 8) * 8)
    n_sx = pl.cdiv(Sx, bsx)

    kernel = partial(cross_attention_kernel,
                     num_heads=num_heads, head_size=head_size, all_head=A,
                     attn_mxu_dtype=attn_mxu_dtype)

    flops = 2 * B * (Sx * D * A          # q projection
                     + Sy * D * 2 * A    # fused k/v projection
                     + Sx * Sy * A       # scores  (H * Sx * Sy * head_size)
                     + Sx * Sy * A       # p @ v
                     + Sx * A * D)       # output projection
    transcendentals = B * num_heads * Sx * Sy
    itm = x.dtype.itemsize
    bytes_accessed = int(x.size * itm
                         + y.size * itm * n_sx
                         + B * Sx * D * itm
                         + (wq_t.size + wkv_t.size + wo_t.size + bo.size)
                         * wq_t.dtype.itemsize)

    return pl.pallas_call(
        kernel,
        out_shape=jax.ShapeDtypeStruct((B, Sx, D), x.dtype),
        grid_spec=pltpu.PrefetchScalarGridSpec(
            num_scalar_prefetch=0,
            grid=(B, n_sx),
            in_specs=[
                pl.BlockSpec((1, bsx, D), lambda b, i: (b, i, 0)),   # x  (Sx tile)
                pl.BlockSpec((1, Sy, D), lambda b, i: (b, 0, 0)),    # y  (full Sy)
                pl.BlockSpec((D, A), lambda b, i: (0, 0)),           # Wq^T
                pl.BlockSpec((D, 2 * A), lambda b, i: (0, 0)),       # [Wk | Wv]^T
                pl.BlockSpec((A, D), lambda b, i: (0, 0)),           # Wo^T
                pl.BlockSpec((1, D), lambda b, i: (0, 0)),           # bo
            ],
            out_specs=pl.BlockSpec((1, bsx, D), lambda b, i: (b, i, 0)),
        ),
        compiler_params=pltpu.CompilerParams(
            dimension_semantics=("parallel", "parallel"),
            vmem_limit_bytes=48 * 1024 * 1024,
        ),
        cost_estimate=pl.CostEstimate(flops=flops,
                                      transcendentals=transcendentals,
                                      bytes_accessed=bytes_accessed),
    )(x, y, wq_t, wkv_t, wo_t, bo2)
    # TODO(synk): for very long Sy, add a flash-style Sy grid axis with online softmax.


def reference(x, y, wq_t, wk_t, wv_t, wo_t, bo, *, num_heads):
    """Pure-JAX reference mirroring the PyTorch forward."""
    B, Sx, D = x.shape
    A = wq_t.shape[1]
    h = A // num_heads
    q = (x @ wq_t).reshape(B, Sx, num_heads, h).transpose(0, 2, 1, 3)
    k = (y @ wk_t).reshape(B, -1, num_heads, h).transpose(0, 2, 1, 3)
    v = (y @ wv_t).reshape(B, -1, num_heads, h).transpose(0, 2, 1, 3)
    s = jnp.einsum("bhqd,bhkd->bhqk", q, k) / math.sqrt(h)
    p = jax.nn.softmax(s, axis=-1)
    ctx = jnp.einsum("bhqk,bhkd->bhqd", p, v)
    ctx = ctx.transpose(0, 2, 1, 3).reshape(B, Sx, A)
    return ctx @ wo_t + bo


if __name__ == "__main__":
    # Small shapes consistent with the module.
    B, Sx, Sy = 2, 8, 8
    hidden_size = 32
    all_head_size = 32
    head_num = 4

    key = jax.random.PRNGKey(0)
    kx, ky, kq, kk, kv, ko, kb = jax.random.split(key, 7)

    x = jax.random.normal(kx, (B, Sx, hidden_size), dtype=jnp.float32)
    y = jax.random.normal(ky, (B, Sy, hidden_size), dtype=jnp.float32)

    # Deterministic parameter init (PyTorch-Linear-like uniform +-1/sqrt(fan_in)).
    bound_q = 1.0 / math.sqrt(hidden_size)
    bound_o = 1.0 / math.sqrt(all_head_size)
    # Weights stored pre-transposed to (in_features, out_features).
    wq_t = jax.random.uniform(kq, (hidden_size, all_head_size), jnp.float32, -bound_q, bound_q)
    wk_t = jax.random.uniform(kk, (hidden_size, all_head_size), jnp.float32, -bound_q, bound_q)
    wv_t = jax.random.uniform(kv, (hidden_size, all_head_size), jnp.float32, -bound_q, bound_q)
    wo_t = jax.random.uniform(ko, (all_head_size, hidden_size), jnp.float32, -bound_o, bound_o)
    bo   = jax.random.uniform(kb, (hidden_size,), jnp.float32, -bound_o, bound_o)

    out = cross_attention(x, y, wq_t, wk_t, wv_t, wo_t, bo, num_heads=head_num)
    out = jax.block_until_ready(out)

    ref = reference(x, y, wq_t, wk_t, wv_t, wo_t, bo, num_heads=head_num)
    assert out.shape == (B, Sx, hidden_size)
    # bf16 MXU inputs + approximate reciprocal => slightly looser tolerance than f32.
    assert jnp.allclose(out, ref, atol=2e-2, rtol=2e-2), "mismatch vs JAX reference"

    print("KERNEL_OK")
</pallas_src>

<mosaic_0001>
module attributes {stable_mosaic.version = 11 : i64} {
  func.func @cross_attention_kernel(%arg0: i32, %arg1: i32, %arg2: memref<1x8x32xf32, #tpu.memory_space<vmem>>, %arg3: memref<1x8x32xf32, #tpu.memory_space<vmem>>, %arg4: memref<32x32xf32, #tpu.memory_space<vmem>>, %arg5: memref<32x64xf32, #tpu.memory_space<vmem>>, %arg6: memref<32x32xf32, #tpu.memory_space<vmem>>, %arg7: memref<1x32xf32, #tpu.memory_space<vmem>>, %arg8: memref<1x8x32xf32, #tpu.memory_space<vmem>>) attributes {dimension_semantics = [#tpu.dimension_semantics<parallel>, #tpu.dimension_semantics<parallel>], iteration_bounds = array<i64: 2, 1>, scalar_prefetch = 0 : i64, scratch_operands = 0 : i64, tpu.core_type = #tpu.core_type<tc>, window_params = [{transform_indices = @transform_0, window_bounds = array<i64: 1, 8, 32>}, {transform_indices = @transform_1, window_bounds = array<i64: 1, 8, 32>}, {pipeline_mode = #tpu.pipeline_mode<synchronous>, transform_indices = @transform_2, window_bounds = array<i64: 32, 32>}, {pipeline_mode = #tpu.pipeline_mode<synchronous>, transform_indices = @transform_3, window_bounds = array<i64: 32, 64>}, {pipeline_mode = #tpu.pipeline_mode<synchronous>, transform_indices = @transform_4, window_bounds = array<i64: 32, 32>}, {pipeline_mode = #tpu.pipeline_mode<synchronous>, transform_indices = @transform_5, window_bounds = array<i64: 1, 32>}, {transform_indices = @transform_6, window_bounds = array<i64: 1, 8, 32>}]} {
    %c0 = arith.constant 0 : index
    %c0_0 = arith.constant 0 : index
    %c0_1 = arith.constant 0 : index
    %0 = vector.load %arg2[%c0, %c0_0, %c0_1] : memref<1x8x32xf32, #tpu.memory_space<vmem>>, vector<1x8x32xf32>
    %1 = vector.shape_cast %0 : vector<1x8x32xf32> to vector<8x32xf32>
    %c0_2 = arith.constant 0 : index
    %c0_3 = arith.constant 0 : index
    %c0_4 = arith.constant 0 : index
    %2 = vector.load %arg3[%c0_2, %c0_3, %c0_4] : memref<1x8x32xf32, #tpu.memory_space<vmem>>, vector<1x8x32xf32>
    %3 = vector.shape_cast %2 : vector<1x8x32xf32> to vector<8x32xf32>
    %c0_5 = arith.constant 0 : index
    %c0_6 = arith.constant 0 : index
    %4 = vector.load %arg4[%c0_5, %c0_6] : memref<32x32xf32, #tpu.memory_space<vmem>>, vector<32x32xf32>
    %cst = arith.constant dense<0.000000e+00> : vector<8x32xf32>
    %5 = tpu.matmul %1, %4, %cst {dimension_numbers = #tpu.dot_dimension_numbers<[1], [0], [0], [1], [0, 0, 1, 1], [], []>} : vector<8x32xf32>, vector<32x32xf32>, vector<8x32xf32> -> vector<8x32xf32>
    %c0_7 = arith.constant 0 : index
    %c0_8 = arith.constant 0 : index
    %6 = vector.load %arg5[%c0_7, %c0_8] : memref<32x64xf32, #tpu.memory_space<vmem>>, vector<32x64xf32>
    %cst_9 = arith.constant dense<0.000000e+00> : vector<8x64xf32>
    %7 = tpu.matmul %3, %6, %cst_9 {dimension_numbers = #tpu.dot_dimension_numbers<[1], [0], [0], [1], [0, 0, 1, 1], [], []>} : vector<8x32xf32>, vector<32x64xf32>, vector<8x64xf32> -> vector<8x64xf32>
    %8 = vector.extract_strided_slice %7 {offsets = [0, 0], sizes = [8, 32], strides = [1, 1]} : vector<8x64xf32> to vector<8x32xf32>
    %9 = vector.extract_strided_slice %7 {offsets = [0, 32], sizes = [8, 32], strides = [1, 1]} : vector<8x64xf32> to vector<8x32xf32>
    %cst_10 = arith.constant 0.353553385 : f32
    %10 = vector.broadcast %cst_10 : f32 to vector<8x32xf32>
    %11 = arith.mulf %5, %10 : vector<8x32xf32>
    %12 = vector.shape_cast %11 : vector<8x32xf32> to vector<8x4x8xf32>
    %13 = tpu.transpose %12, [1, 0, 2] : vector<8x4x8xf32> -> vector<4x8x8xf32>
    %14 = vector.shape_cast %8 : vector<8x32xf32> to vector<8x4x8xf32>
    %15 = tpu.transpose %14, [1, 0, 2] : vector<8x4x8xf32> -> vector<4x8x8xf32>
    %16 = vector.shape_cast %9 : vector<8x32xf32> to vector<8x4x8xf32>
    %17 = tpu.transpose %16, [1, 0, 2] : vector<8x4x8xf32> -> vector<4x8x8xf32>
    %18 = arith.truncf %13 : vector<4x8x8xf32> to vector<4x8x8xbf16>
    %19 = arith.truncf %15 : vector<4x8x8xf32> to vector<4x8x8xbf16>
    "tpu.trace_start"() <{level = 10 : i32, message = "hqd,hkd->hqk"}> : () -> ()
    %cst_11 = arith.constant dense<0.000000e+00> : vector<4x8x8xf32>
    %20 = tpu.matmul %18, %19, %cst_11 {dimension_numbers = #tpu.dot_dimension_numbers<[2], [2], [1], [1], [0, 0, 0, 1, 1, 1], [0], [0]>} : vector<4x8x8xbf16>, vector<4x8x8xbf16>, vector<4x8x8xf32> -> vector<4x8x8xf32>
    "tpu.trace_stop"() : () -> ()
    %cst_12 = arith.constant dense<0xFF800000> : vector<4x8xf32>
    %21 = vector.multi_reduction <maximumf>, %20, %cst_12 [2] : vector<4x8x8xf32> to vector<4x8xf32>
    %22 = vector.shape_cast %21 : vector<4x8xf32> to vector<4x8x1xf32>
    %23 = vector.broadcast %22 : vector<4x8x1xf32> to vector<4x8x8xf32>
    %24 = arith.subf %20, %23 : vector<4x8x8xf32>
    %25 = math.exp %24 : vector<4x8x8xf32>
    %cst_13 = arith.constant dense<0.000000e+00> : vector<4x8xf32>
    %26 = vector.multi_reduction <add>, %25, %cst_13 [2] : vector<4x8x8xf32> to vector<4x8xf32>
    %27 = vector.shape_cast %26 : vector<4x8xf32> to vector<4x8x1xf32>
    %28 = tpu.reciprocal %27 {approx = true} : vector<4x8x1xf32> -> vector<4x8x1xf32>
    %29 = vector.broadcast %28 : vector<4x8x1xf32> to vector<4x8x8xf32>
    %30 = arith.mulf %25, %29 : vector<4x8x8xf32>
    %31 = arith.truncf %30 : vector<4x8x8xf32> to vector<4x8x8xbf16>
    %32 = arith.truncf %17 : vector<4x8x8xf32> to vector<4x8x8xbf16>
    "tpu.trace_start"() <{level = 10 : i32, message = "hqk,hkd->hqd"}> : () -> ()
    %cst_14 = arith.constant dense<0.000000e+00> : vector<4x8x8xf32>
    %33 = tpu.matmul %31, %32, %cst_14 {dimension_numbers = #tpu.dot_dimension_numbers<[2], [1], [1], [2], [0, 0, 0, 1, 1, 2], [0], [0]>} : vector<4x8x8xbf16>, vector<4x8x8xbf16>, vector<4x8x8xf32> -> vector<4x8x8xf32>
    "tpu.trace_stop"() : () -> ()
    %34 = tpu.transpose %33, [1, 0, 2] : vector<4x8x8xf32> -> vector<8x4x8xf32>
    %35 = vector.shape_cast %34 : vector<8x4x8xf32> to vector<8x32xf32>
    %c0_15 = arith.constant 0 : index
    %c0_16 = arith.constant 0 : index
    %36 = vector.load %arg6[%c0_15, %c0_16] : memref<32x32xf32, #tpu.memory_space<vmem>>, vector<32x32xf32>
    %cst_17 = arith.constant dense<0.000000e+00> : vector<8x32xf32>
    %37 = tpu.matmul %35, %36, %cst_17 {dimension_numbers = #tpu.dot_dimension_numbers<[1], [0], [0], [1], [0, 0, 1, 1], [], []>} : vector<8x32xf32>, vector<32x32xf32>, vector<8x32xf32> -> vector<8x32xf32>
    %c0_18 = arith.constant 0 : index
    %c0_19 = arith.constant 0 : index
    %38 = vector.load %arg7[%c0_18, %c0_19] : memref<1x32xf32, #tpu.memory_space<vmem>>, vector<1x32xf32>
    %39 = vector.broadcast %38 : vector<1x32xf32> to vector<8x32xf32>
    %40 = arith.addf %37, %39 : vector<8x32xf32>
    %c0_20 = arith.constant 0 : index
    %c0_21 = arith.constant 0 : index
    %c0_22 = arith.constant 0 : index
    %41 = vector.load %arg8[%c0_20, %c0_21, %c0_22] : memref<1x8x32xf32, #tpu.memory_space<vmem>>, vector<1x8x32xf32>
    %42 = vector.shape_cast %41 : vector<1x8x32xf32> to vector<8x32xf32>
    %43 = vector.shape_cast %40 : vector<8x32xf32> to vector<1x8x32xf32>
    tpu.vector_store %arg8[%c0_20, %c0_21, %c0_22], %43 {strides = array<i32>} : memref<1x8x32xf32, #tpu.memory_space<vmem>>, vector<1x8x32xf32>,
    return
  }
  func.func @transform_0(%arg0: i32, %arg1: i32) -> (i32, i32, i32) {
    %c0_i32 = arith.constant 0 : i32
    %c0_i32_0 = arith.constant 0 : i32
    return %arg0, %arg1, %c0_i32 : i32, i32, i32
  }
  func.func @transform_1(%arg0: i32, %arg1: i32) -> (i32, i32, i32) {
    %c0_i32 = arith.constant 0 : i32
    %c0_i32_0 = arith.constant 0 : i32
    %c0_i32_1 = arith.constant 0 : i32
    return %arg0, %c0_i32, %c0_i32_0 : i32, i32, i32
  }
  func.func @transform_2(%arg0: i32, %arg1: i32) -> (i32, i32) {
    %c0_i32 = arith.constant 0 : i32
    %c0_i32_0 = arith.constant 0 : i32
    %c0_i32_1 = arith.constant 0 : i32
    return %c0_i32, %c0_i32_0 : i32, i32
  }
  func.func @transform_3(%arg0: i32, %arg1: i32) -> (i32, i32) {
    %c0_i32 = arith.constant 0 : i32
    %c0_i32_0 = arith.constant 0 : i32
    %c0_i32_1 = arith.constant 0 : i32
    return %c0_i32, %c0_i32_0 : i32, i32
  }
  func.func @transform_4(%arg0: i32, %arg1: i32) -> (i32, i32) {
    %c0_i32 = arith.constant 0 : i32
    %c0_i32_0 = arith.constant 0 : i32
    %c0_i32_1 = arith.constant 0 : i32
    return %c0_i32, %c0_i32_0 : i32, i32
  }
  func.func @transform_5(%arg0: i32, %arg1: i32) -> (i32, i32) {
    %c0_i32 = arith.constant 0 : i32
    %c0_i32_0 = arith.constant 0 : i32
    %c0_i32_1 = arith.constant 0 : i32
    return %c0_i32, %c0_i32_0 : i32, i32
  }
  func.func @transform_6(%arg0: i32, %arg1: i32) -> (i32, i32, i32) {
    %c0_i32 = arith.constant 0 : i32
    %c0_i32_0 = arith.constant 0 : i32
    return %arg0, %arg1, %c0_i32 : i32, i32, i32
  }
}

</mosaic_0001>

<bundles_post_ra>
// kernel: tpu_custom_call.1
= control target key start
LH: loop header
LB: loop body
LE: loop exit
PB: predicated region body
PF: predicated region fallthrough
CT: control target
= control target key end

     0   :  { %s2738_s0 = inlined_call_operand.hbm [shape: f32[2,8,32], index: 0, kind: input, shape index: {}]   ;;  %s2739_s1 = inlined_call_operand.hbm [shape: f32[2,8,32], index: 1, kind: input, shape index: {}]   ;;  %s2740_s2 = inlined_call_operand.hbm [shape: f32[32,32], index: 2, kind: input, shape index: {}]   ;;  %s2741_s3 = inlined_call_operand.hbm [shape: f32[32,64], index: 3, kind: input, shape index: {}]   ;;  %s2742_s4 = inlined_call_operand.hbm [shape: f32[32,32], index: 4, kind: input, shape index: {}]   ;;  %s2743_s5 = inlined_call_operand.vmem [shape: f32[1,32], index: 5, kind: input, shape index: {}]   ;;  %s2744_s6 = inlined_call_operand.hbm [shape: f32[2,8,32], index: 6, kind: output, shape index: {}]  }
   0x1   :  { %2747 = sst [smem:[#allocation17_spill]] %s2738_s0 }
   0x2   :  { %2748 = sst [smem:[#allocation18_spill]] %s2740_s2 }
   0x3   :  { %2749 = sst [smem:[#allocation19_spill]] %s2741_s3 }
   0x4   :  { %2750 = sst [smem:[#allocation20_spill]] %s2742_s4 }
   0x5   :  { %11 = vsyncpa [#allocation3], 0 }
   0x6   :  { %13 = vsyncpa [#allocation3 + $0x1], 0 }
   0x7   :  { %14 = vsyncpa [#allocation6], 0 }
   0x8   :  { %16 = vsyncpa [#allocation6 + $0x1], 0 }
   0x9   :  { %17 = vsyncpa [#allocation9], 0 }
   0xa   :  { %18 = vsyncpa [#allocation4], 0 }
   0xb   :  { %20 = vsyncpa [#allocation4 + $0x1], 0  ;;  %s2340_s21 = smov 0   ;;  %s2342_s22 = smov 0  }
   0xc   :  { %s2344_s23 = smov 0   ;;  %s2346_s24 = smov 0  }
   0xd   :  { %s2348_s25 = smov 0   ;;  %s2350_s26 = smov 0  }
   0xe LB: > { %s2371_s27 = sadd.s32 4294967295, %s2284_s26   ;;  %s1778_s28 = sadd.s32 4294967294, %s2284_s26   ;;  %s2284_s26 = sphi %s2350_s26, %s26_s26   ;;  %s2280_s25 = sphi %s2348_s25, %s2773_s25   ;;  %s2276_s24 = sphi %s2346_s24, %s2772_s24   ;;  %s2272_s23 = sphi %s2344_s23, %s2771_s23   ;;  %s2268_s22 = sphi %s2342_s22, %s2770_s22   ;;  %s2264_s21 = sphi %s2340_s21, %s2769_s21  }
   0xf   : > { %p60_p0 = scmp.ne.s32.totalorder %s2268_s22, %s2264_s21  ;;  %p2745_p1 = scmp.eq.s32.totalorder %s2371_s27, 0 }
  0x10   : > { %p202_p3 = scmp.eq.s32.totalorder %s1778_s28, 1  ;;  %p1779_p5 = scmp.ge.s32.totalorder %s2284_s26, 1 }
  0x11   : > { %p2380_p4 = por %p2745_p1, %p60_p0  ;;  %p209_p7 = scmp.lt.s32.totalorder %s2284_s26, 3 }
  0x12   : > { %p2385_p6 = por %p202_p3, %p60_p0  ;;  %s2286_s8 = smov [#allocation7]  }
  0x13   : > { %s2751_s29 = scalar_select %p2380_p4, 1, 0 }
  0x14   : > { %s2752_s30 = scalar_select %p2385_p6, 1, 0 }
  0x15   : > { %p2390_p8 = pnand %p1779_p5, %p209_p7  ;;  %s221_s9 = sshll.u32 %s2286_s8, 4  ;;  %s222_s9 = int_to_ptr.vmem [resolvable:$true] %s221_s9 }
  0x16   : > { %s2287_s11 = smov [#allocation8]   ;;  %s2288_s13 = smov [#allocation10]  }
  0x17   : > { %p1949_p9 = pneg %p2390_p8  ;;  %s234_s12 = sshll.u32 %s2287_s11, 4  ;;  %s235_s12 = int_to_ptr.vmem [resolvable:$true] %s234_s12 }
  0x18   : > { %s247_s14 = sshll.u32 %s2288_s13, 4  ;;  %s2069_s15 = scalar_lea.vmem %s222_s9, 512  ;;  %s248_s14 = int_to_ptr.vmem [resolvable:$true] %s247_s14 }
  0x19   : > { %p2399_p11 = pnand %p1949_p9, %p2745_p1  ;;  %p2070_p13 = scmp.ne.s32.totalorder %s222_s9, %s2069_s15 }
  0x1a   : > { %p2077_p5 = scmp.lt.s32.totalorder %s222_s9, %s222_s9  ;;  %p2078_p7 = scmp.lt.s32.totalorder %s2069_s15, %s2069_s15 }
  0x1b   : > { %p2060_p12 = pneg %p2399_p11 }
  0x1c   : > { %p2079_p9 = por %p2078_p7, %p2077_p5 }
  0x1d   : > { %p2072_p0 = pnand %p2070_p13, %p2060_p12 }
  0x1f   : > { %p2073_p3 = pneg %p2072_p0 }
  0x21   : > { %p2080_p10 = pnand %p2079_p9, %p2073_p3 }
  0x23   : > { %2083 = shalt.err (!%p2080_p10)
}
  0x24   : > { %s2289_s16 = smov 128   ;;  %s2290_s17 = smov 8  }
  0x25   : > { %s2755_s2 = sld [smem:[#allocation18_spill]]  ;;  %s2095_s20 = scalar_lea.vmem %s235_s12, 512 }
  0x26   : > { %p2096_p1 = scmp.ne.s32.totalorder %s235_s12, %s2095_s20  ;;  %p2103_p2 = scmp.lt.s32.totalorder %s235_s12, %s235_s12 }
  0x27   : > { %p2104_p6 = scmp.lt.s32.totalorder %s2095_s20, %s2095_s20 }
  0x28   : > { %p2098_p13 = pnand %p2096_p1, %p2060_p12 }
  0x29   : > { %p2105_p5 = por %p2104_p6, %p2103_p2 }
  0x2a   : > { %p2099_p0 = pneg %p2098_p13 }
  0x2b   : > { %1952 = dma.hbm_to_vmem [thread:$0]  (!%p2399_p11), %s2755_s2, 512, %s222_s9, [#allocation6], %s2289_s16, %s2289_s16, %s2290_s17  }
  0x2c   : > { %p2106_p3 = pnand %p2105_p5, %p2099_p0 }
  0x2e   : > { %2109 = shalt.err (!%p2106_p3)
}
  0x2f   : > { %s2756_s3 = sld [smem:[#allocation19_spill]]  ;;  %s2121_s9 = scalar_lea.vmem %s248_s14, 512 }
  0x30   : > { %p2122_p10 = scmp.ne.s32.totalorder %s248_s14, %s2121_s9  ;;  %p2129_p9 = scmp.lt.s32.totalorder %s248_s14, %s248_s14 }
  0x31   : > { %p2130_p13 = scmp.lt.s32.totalorder %s2121_s9, %s2121_s9 }
  0x32   : > { %p2124_p7 = pnand %p2122_p10, %p2060_p12 }
  0x33   : > { %p2131_p4 = por %p2130_p13, %p2129_p9 }
  0x34   : > { %p2125_p1 = pneg %p2124_p7 }
  0x35   : > { %1955 = dma.hbm_to_vmem [thread:$0]  (!%p2399_p11), %s2756_s3, 512, %s235_s12, [#allocation9], %s2289_s16, %s2289_s16, %s2290_s17  }
  0x36   : > { %p2132_p2 = pnand %p2131_p4, %p2125_p1 }
  0x38   : > { %2135 = shalt.err (!%p2132_p2)
}
  0x39   : > { %s2757_s4 = sld [smem:[#allocation20_spill]]  ;;  %s47_s12 = sadd.s32 1, %s2272_s23 }
  0x3a   : > { %s38_s15 = sadd.s32 1, %s2280_s25  ;;  %p54_p4 = scmp.ne.s32.totalorder %s2272_s23, %s2268_s22 }
  0x3b   : > { %p40_p6 = scmp.ge.s32.totalorder %s38_s15, 2  ;;  %p55_p12 = scmp.eq.s32.totalorder %s2284_s26, 0 }
  0x3c   : > { %p2758_p0 = scmp.eq.s32.totalorder %s2371_s27, 1  ;;  %p1973_p3 = scmp.lt.s32.totalorder %s2284_s26, 2 }
  0x3d   : > { %s2775_s15 = smov (%p40_p6, %s38_s15), 0  ;;  %p56_p10 = por %p55_p12, %p54_p4 }
  0x3e   : > { %p2436_p5 = por %p2758_p0, %p54_p4  ;;  %s264_s18 = sand.u32 1, %s2272_s23  }
  0x3f   : > { %1958 = dma.hbm_to_vmem [thread:$0]  (!%p2399_p11), %s2757_s4, 512, %s248_s14, [#allocation9], %s2289_s16, %s2289_s16, %s2290_s17  }
  0x40   : > { %s42_s19 = ssub.s32 %s2280_s25, %s2775_s15  ;;  %s1784_s14 = sshll.u32 %s264_s18, 3 }
  0x41   : > { %p45_p11 = scmp.eq.s32.totalorder %s42_s19, 0  ;;  %s1785_s16 = sshll.u32 %s2280_s25, 7 }
  0x42   : > { %s2760_s0 = sld [smem:[#allocation17_spill]]  ;;  %s268_s9 = scalar_lea.vmem [#allocation2], %s1784_s14 }
  0x43   : > { %s2448_s17 = scalar_select %p45_p11, %s2272_s23, %s47_s12  }
  0x44   : > { %s276_s11 = sshll.u32 %s268_s9, 4  ;;  %p2455_p7 = pnand %p1973_p3, %p56_p10  ;;  %s277_s11 = int_to_ptr.vmem [resolvable:$true] %s276_s11 }
  0x45   : > { %s2462_s19 = scalar_lea.hbm %s2739_s1, %s1785_s16  ;;  %s283_s12 = sand.u32 1, %s2284_s26  }
  0x46   : > { %s265_s4 = scalar_lea.sflag [#allocation3], %s264_s18  ;;  %p2138_p1 = pneg %p2455_p7 }
  0x47   : > { %s2149_s20 = scalar_lea.vmem %s277_s11, 128  ;;  %s2291_s28 = smov [#allocation2]  }
  0x48   : > { %s274_s8 = scalar_lea.hbm %s2760_s0, %s1785_s16  ;;  %p2150_p9 = scmp.ne.s32.totalorder %s277_s11, %s2149_s20 }
  0x49   : > { %s2154_s9 = sshll.u32 %s2291_s28, 4  ;;  %s2155_s9 = int_to_ptr.vmem [resolvable:$false] %s2154_s9 }
  0x4a   : > { %p2152_p13 = pnand %p2150_p9, %p2138_p1  ;;  %s2156_s0 = scalar_lea.vmem %s2155_s9, 256 }
  0x4b   : > { %p2157_p4 = scmp.lt.s32.totalorder %s277_s11, %s2155_s9  ;;  %p2158_p6 = scmp.lt.s32.totalorder %s2156_s0, %s2149_s20 }
  0x4c   : > { %p2153_p2 = pneg %p2152_p13 }
  0x4d   : > { %p2159_p12 = por %p2158_p6, %p2157_p4 }
  0x4f   : > { %p2160_p0 = pnand %p2159_p12, %p2153_p2 }
  0x51   : > { %2163 = shalt.err (!%p2160_p0)
}
  0x52   : > { %1962 = dma.hbm_to_vmem [thread:$0]  (!%p2455_p7), %s274_s8, 128, %s277_s11, %s265_s4  }
  0x53   : > { %s287_s2 = scalar_lea.vmem [#allocation5], %s1784_s14  ;;  %s284_s18 = scalar_lea.sflag [#allocation6], %s283_s12 }
  0x54   : > { %s294_s3 = sshll.u32 %s287_s2, 4  ;;  %s2292_s28 = smov [#allocation5]   ;;  %s295_s3 = int_to_ptr.vmem [resolvable:$true] %s294_s3 }
  0x55   : > { %s2177_s16 = scalar_lea.vmem %s295_s3, 128  ;;  %s2182_s9 = sshll.u32 %s2292_s28, 4  ;;  %s2183_s9 = int_to_ptr.vmem [resolvable:$false] %s2182_s9 }
  0x56   : > { %p2178_p3 = scmp.ne.s32.totalorder %s295_s3, %s2177_s16  ;;  %s2184_s0 = scalar_lea.vmem %s2183_s9, 256 }
  0x57   : > { %p2185_p9 = scmp.lt.s32.totalorder %s295_s3, %s2183_s9  ;;  %p2186_p13 = scmp.lt.s32.totalorder %s2184_s0, %s2177_s16 }
  0x58   : > { %p2180_p10 = pnand %p2178_p3, %p2138_p1 }
  0x59   : > { %p2187_p2 = por %p2186_p13, %p2185_p9 }
  0x5a   : > { %p2181_p11 = pneg %p2180_p10 }
  0x5c   : > { %p2188_p4 = pnand %p2187_p2, %p2181_p11 }
  0x5e   : > { %2191 = shalt.err (!%p2188_p4)
}
  0x5f   : > { %1965 = dma.hbm_to_vmem [thread:$0]  (!%p2455_p7), %s2462_s19, 128, %s295_s3, %s284_s18  }
  0x60   : > { %303 = sbr.rel (%p2390_p8) target bundleno = 1566 (0x61e), region = 44  ;;  %s2481_s4 = sand.u32 (!%p2390_p8), 1, %s2268_s22  }
  0x61   : > { %s2484_s14 = sshll.u32 (!%p2390_p8), %s2481_s4, 3  ;;  %s306_s8 = scalar_lea.sflag (!%p2390_p8), [#allocation3], %s2481_s4 }
  0x62   : > { %s309_s11 = scalar_lea.vmem (!%p2390_p8), [#allocation2], %s2484_s14  ;;  %p2762_p1 = scmp.ne.s32.totalorder (!%p2390_p8), %s2751_s29, 0 }
  0x65   : > { %2243 = dma.done.wait (%p2762_p1), %s306_s8, 128  }
  0x66   : > { %2245 = vsyncadd (%p2762_p1), %s306_s8, 4294967168  ;;  %s314_s7 = sand.u32 1, %s2371_s27   ;;  %s318_s19 = scalar_lea.vmem [#allocation5], %s2484_s14 }
  0x67   : > { %s315_s13 = scalar_lea.sflag [#allocation6], %s314_s7 }
  0x68   : > { %2247 = dma.done.wait (%p2762_p1), %s315_s13, 128  }
  0x69   : > { %2249 = vsyncadd (%p2762_p1), %s315_s13, 4294967168  ;;  %p2763_p8 = scmp.eq.s32.totalorder %s2371_s27, 0 }
  0x6b   : > { %2251 = dma.done.wait (%p2763_p8), [#allocation6], 512   ;;  %p2764_p7 = pmov %p2763_p8 }
  0x6d   : > { %2253 = vsyncadd (%p2764_p7), [#allocation6], 4294966784  ;;  %p2765_p6 = pmov %p2764_p7 }
  0x6f   : > { %2255 = dma.done.wait (%p2765_p6), [#allocation9], 1024   ;;  %p2766_p12 = pmov %p2765_p6 }
  0x70   : > { %v2293_v0 = vmov 0.0   ;;  %vm2294_vm0 = vmmov 0   ;;  %v448_v1 = vld [vmem:[#allocation8 + $0x18] sm:$0xff]  ;;  %v447_v3 = vld [vmem:[#allocation8 + $0x10] sm:$0xff]  ;;  %v446_v5 = vld [vmem:[#allocation8 + $0x8] sm:$0xff]  ;;  %vm371_vm1 = vcmask 261120   ;;  %v538_v18 = vlaneseq }
  0x71   : > { %2257 = vsyncadd (%p2766_p12), [#allocation9], 4294966272  ;;  %1861 = vmatprep.subr.mxu1 %v2293_v0  ;;  %1850 = vmatprep.subr.mxu0 %v2293_v0  ;;  %v370_v2 = vld [vmem:[#allocation7 + $0x18] sm:$0xff]  ;;  %v369_v4 = vld [vmem:[#allocation7 + $0x10] sm:$0xff]  ;;  %s2295_s27 = smov 104   ;;  %s2296_s29 = smov 120  }
  0x72   : > { %1869 = vmatprep.mubr.msk.f32.mxu1 %vm2294_vm0, %v2293_v0  ;;  %1858 = vmatprep.mubr.msk.f32.mxu0 %vm2294_vm0, %v2293_v0  ;;  %v368_v6 = vld [vmem:[#allocation7 + $0x8] sm:$0xff]  ;;  %v445_v7 = vld [vmem:[#allocation8] sm:$0xff]  ;;  %v366_v9 = vld [vmem:[%s318_s19] sm:$0xff]  ;;  %s2297_s12 = smov 112   ;;  %v2298_v16 = vmov 1983009808  }
  0x73   : > { %1862 = vmatpush3.msra.mxu1 %v448_v1  ;;  %1851 = vmatpush3.msra.mxu0 %v370_v2  ;;  %v367_v8 = vld [vmem:[#allocation7] sm:$0xff]  ;;  %v536_v17 = vunpack.c.l.s4 %v2298_v16  ;;  %v2299_v19 = vmov 1934713408   ;;  %v539_v22 = vshrl.u32 %v538_v18, 7  ;;  %vm971_vm2 = vcmask 64512   ;;  %s2300_s20 = smov 96  }
  0x74   : > { %1863 = vmatprep.subr.mxu1 %v2293_v0  ;;  %1852 = vmatprep.subr.mxu0 %v2293_v0  ;;  %v365_v10 = vld [vmem:[%s309_s11] sm:$0xff]  ;;  %v568_v20 = vunpack.c.l.s4 %v2299_v19  ;;  %vm1211_vm3 = vcmask 1043456   ;;  %s2301_s2 = smov 16   ;;  %s2302_s3 = smov 8   ;;  %vm1542_vm4 = vcmask 130048   ;;  %vm1544_vm5 = vcmask 195584  }
  0x75   : > { %1864 = vmatpush3.msra.mxu1 %v447_v3  ;;  %1853 = vmatpush3.msra.mxu0 %v369_v4  ;;  %v537_v21 = vunpack.c.0.s8 %v536_v17  ;;  %s2303_s18 = smov 24   ;;  %s1816_s9 = sshll.u32 %s2276_s24, 7 }
  0x76   : > { %1865 = vmatprep.subr.mxu1 %v2293_v0  ;;  %1854 = vmatprep.subr.mxu0 %v2293_v0  ;;  %v569_v25 = vunpack.c.0.s8 %v568_v20  ;;  %s363_s0 = scalar_lea.vmem [#allocation11], %s2484_s14  ;;  %s2695_s13 = scalar_lea.hbm %s2744_s6, %s1816_s9 }
  0x77   : > { %1866 = vmatpush3.msra.mxu1 %v446_v5  ;;  %1855 = vmatpush3.msra.mxu0 %v368_v6  ;;  %v2539_v26 = vsub.s32 %v537_v21, %v539_v22  ;;  %s1646_s8 = sshll.u32 %s363_s0, 4  ;;  %s1632_s19 = scalar_lea.sflag [#allocation4], %s2481_s4  ;;  %s1647_s8 = int_to_ptr.vmem [resolvable:$true] %s1646_s8 }
  0x78   : > { %1867 = vmatprep.subr.mxu1 %v2293_v0  ;;  %1856 = vmatprep.subr.mxu0 %v2293_v0  ;;  %v2551_v33 = vsub.s32 %v569_v25, %v539_v22  ;;  %s2304_s24 = smov [#allocation11]  }
  0x79   : > { %1868 = vmatpush3.msra.mxu1 %v445_v7  ;;  %1857 = vmatpush3.msra.mxu0 %v367_v8  ;;  %s2196_s14 = sshll.u32 %s2304_s24, 4  ;;  %s2197_s14 = int_to_ptr.vmem [resolvable:$false] %s2196_s14 }
  0x7a   : > { %1870 = vmatmul.mubr.msk.f32.vlgmr.msra.gmra.mxu1 %vm371_vm1, %v366_v9  ;;  %1859 = vmatmul.mubr.msk.f32.vlgmr.msra.gmra.mxu0 %vm371_vm1, %v365_v10  ;;  %p2199_p11 = scmp.lt.s32.totalorder %s1647_s8, %s2197_s14 }
  0x7b   : > { %1872 = vmatprep.subr.bf16.mxu0 %v2293_v0  ;;  %1878 = vmatprep.subr.bf16.mxu1 %v2293_v0 }
  0x7c   : > { %1874 = vmatprep.mubr.msk.bf16.mxu0 %vm2294_vm0, %v2293_v0  ;;  %1880 = vmatprep.mubr.msk.bf16.mxu1 %vm2294_vm0, %v2293_v0 }
 0x13a   : > { %v2530_v11 = vpop.f32.mrf.mxu1  ;;  %v441_v12 = vpop.f32.mrf.mxu0 }
 0x13b   : > { %676 = vrot.lane.b32.xlu1 %v2530_v11, %s2295_s27  ;;  %670 = vrot.lane.b32.xlu0 %v2530_v11, %s2296_s29  ;;  %v522_v13 = vmul.f32 0.35355338, %v441_v12 }
 0x13c   : > { %v1871_v14 = vpop.f32.mrf.mxu1  ;;  %v1860_v15 = vpop.f32.mrf.mxu0 }
 0x13f   : > { %673 = vrot.lane.b32.xlu0 %v2530_v11, %s2297_s12  ;;  %524 = vrot.lane.b32.xlu1 %v522_v13, %s2296_s29  ;;  %s2198_s29 = scalar_lea.vmem %s2197_s14, 256 }
 0x143   : > { %527 = vrot.lane.b32.xlu0 %v522_v13, %s2297_s12  ;;  %530 = vrot.lane.b32.xlu1 %v522_v13, %s2295_s27  ;;  %s2192_s27 = scalar_lea.vmem %s1647_s8, 128 }
 0x144   : > { %p2193_p0 = scmp.ne.s32.totalorder %s1647_s8, %s2192_s27  ;;  %p2200_p9 = scmp.lt.s32.totalorder %s2198_s29, %s2192_s27 }
 0x146   : > { %p2194_p3 = pnand %p2193_p0, %p2436_p5  ;;  %p2201_p13 = por %p2200_p9, %p2199_p11 }
 0x148   : > { %p2195_p10 = pneg %p2194_p3 }
 0x14a   : > { %p2202_p2 = pnand %p2201_p13, %p2195_p10 }
 0x1ad   : > { %v2535_v23 = vpop.permute.xlu1 %676  ;;  %v2537_v24 = vpop.permute.xlu0 %670 }
 0x1ae   : > { %v695_v27 = vcombine.low %v2537_v24, %v2535_v23  ;;  %v696_v28 = vcombine.high %v2537_v24, %v2535_v23 }
 0x1b0   : > { %v703_v34 = vrot.slane %v695_v27, %v2539_v26  ;;  %v710_v35 = vrot.slane %v696_v28, %v2539_v26 }
 0x1b1   : > { %v2545_v29 = vpop.permute.xlu0 %673  ;;  %v525_v30 = vpop.permute.xlu1 %524 }
 0x1b2   : > { %v679_v31 = vcombine.low %v2530_v11, %v2545_v29  ;;  %v680_v32 = vcombine.high %v2530_v11, %v2545_v29 }
 0x1b4   : > { %v687_v36 = vrot.slane %v679_v31, %v2539_v26  ;;  %v694_v37 = vrot.slane %v680_v32, %v2539_v26 }
 0x1b5   : > { %v528_v38 = vpop.permute.xlu0 %527  ;;  %v531_v39 = vpop.permute.xlu1 %530 }
 0x1b6   : > { %v711_v40 = vcombine.low %v687_v36, %v703_v34  ;;  %v712_v41 = vcombine.high %v687_v36, %v703_v34  ;;  %v727_v42 = vcombine.low %v694_v37, %v710_v35  ;;  %v728_v43 = vcombine.high %v694_v37, %v710_v35 }
 0x1b7   : > { %v533_v44 = vcombine.low %v522_v13, %v528_v38  ;;  %v534_v45 = vcombine.high %v522_v13, %v528_v38  ;;  %v549_v46 = vcombine.low %v525_v30, %v531_v39  ;;  %v550_v47 = vcombine.high %v525_v30, %v531_v39 }
 0x1b8   : > { %v719_v48 = vrot.slane %v711_v40, %v2551_v33  ;;  %v726_v49 = vrot.slane %v712_v41, %v2551_v33  ;;  %v735_v50 = vrot.slane %v727_v42, %v2551_v33  ;;  %v742_v51 = vrot.slane %v728_v43, %v2551_v33 }
 0x1b9   : > { %v541_v52 = vrot.slane %v533_v44, %v2539_v26  ;;  %v548_v53 = vrot.slane %v534_v45, %v2539_v26  ;;  %v557_v54 = vrot.slane %v549_v46, %v2539_v26  ;;  %v564_v55 = vrot.slane %v550_v47, %v2539_v26 }
 0x1ba   : > { %v747_v56 = vcombine.low %v719_v48, %v726_v49  ;;  %v1799_v57 = vcombine.high %v719_v48, %v726_v49  ;;  %v763_v58 = vcombine.low %v735_v50, %v742_v51  ;;  %v1800_v59 = vcombine.high %v735_v50, %v742_v51 }
 0x1bb   : > { %v565_v60 = vcombine.low %v541_v52, %v557_v54  ;;  %v566_v61 = vcombine.high %v541_v52, %v557_v54  ;;  %v581_v62 = vcombine.low %v548_v53, %v564_v55  ;;  %v582_v63 = vcombine.high %v548_v53, %v564_v55 }
 0x1bc   : > { %v754_v1 = vrot.slane %v747_v56, %v2539_v26  ;;  %v762_v2 = vrot.slane %v1799_v57, %v2539_v26  ;;  %v770_v3 = vrot.slane %v763_v58, %v2539_v26  ;;  %v778_v4 = vrot.slane %v1800_v59, %v2539_v26 }
 0x1bd   : > { %v573_v5 = vrot.slane %v565_v60, %v2551_v33  ;;  %v580_v6 = vrot.slane %v566_v61, %v2551_v33  ;;  %v589_v7 = vrot.slane %v581_v62, %v2551_v33  ;;  %v596_v8 = vrot.slane %v582_v63, %v2551_v33 }
 0x1be   : > { %v779_v9 = vcombine.low %v754_v1, %v762_v2  ;;  %v795_v10 = vcombine.low %v770_v3, %v778_v4  ;;  %v780_v12 = vcombine.high %v754_v1, %v762_v2  ;;  %v796_v13 = vcombine.high %v770_v3, %v778_v4 }
 0x1bf   : > { %v601_v14 = vcombine.low %v573_v5, %v580_v6  ;;  %v1797_v15 = vcombine.high %v573_v5, %v580_v6  ;;  %v617_v16 = vcombine.low %v589_v7, %v596_v8  ;;  %v1798_v17 = vcombine.high %v589_v7, %v596_v8 }
 0x1c0   : > { %v787_v18 = vrot.slane %v779_v9, %v2551_v33  ;;  %v803_v19 = vrot.slane %v795_v10, %v2551_v33  ;;  %v794_v30 = vrot.slane %v780_v12, %v2551_v33  ;;  %v810_v31 = vrot.slane %v796_v13, %v2551_v33 }
 0x1c1   : > { %v608_v20 = vrot.slane %v601_v14, %v2539_v26  ;;  %v616_v21 = vrot.slane %v1797_v15, %v2539_v26  ;;  %v624_v22 = vrot.slane %v617_v16, %v2539_v26  ;;  %v632_v25 = vrot.slane %v1798_v17, %v2539_v26 }
 0x1c2   : > { %v811_v27 = vcombine.low %v787_v18, %v803_v19  ;;  %v812_v28 = vcombine.high %v787_v18, %v803_v19  ;;  %v813_v41 = vcombine.low %v794_v30, %v810_v31  ;;  %v814_v42 = vcombine.high %v794_v30, %v810_v31 }
 0x1c3   : > { %v633_v32 = vcombine.low %v608_v20, %v616_v21  ;;  %v649_v34 = vcombine.low %v624_v22, %v632_v25  ;;  %v634_v43 = vcombine.high %v608_v20, %v616_v21  ;;  %v650_v44 = vcombine.high %v624_v22, %v632_v25 }
 0x1c4   : > { %v967_v35 = vpack.c.bf16 %v811_v27, %v811_v27  ;;  %v968_v36 = vpack.c.bf16 %v812_v28, %v812_v28  ;;  %v969_v47 = vpack.c.bf16 %v813_v41, %v813_v41  ;;  %v970_v48 = vpack.c.bf16 %v814_v42, %v814_v42 }
 0x1c5   : > { %v641_v37 = vrot.slane %v633_v32, %v2551_v33  ;;  %v657_v38 = vrot.slane %v649_v34, %v2551_v33  ;;  %v648_v51 = vrot.slane %v634_v43, %v2551_v33  ;;  %v664_v52 = vrot.slane %v650_v44, %v2551_v33 }
 0x1c6   : > { %v976_v39 = vsel %vm971_vm2, %v967_v35, 0  ;;  %v1022_v40 = vsel %vm971_vm2, %v968_v36, 0  ;;  %v1068_v53 = vsel %vm971_vm2, %v969_v47, 0  ;;  %v1114_v54 = vsel %vm971_vm2, %v970_v48, 0 }
 0x1c7   : > { %1873 = vmatpush3.bf16.xpose.msra.mxu0 %v976_v39  ;;  %1879 = vmatpush3.bf16.xpose.msra.mxu1 %v1022_v40  ;;  %v665_v45 = vcombine.low %v641_v37, %v657_v38  ;;  %v666_v46 = vcombine.high %v641_v37, %v657_v38  ;;  %v667_v55 = vcombine.low %v648_v51, %v664_v52 }
 0x1c8   : > { %1884 = vmatprep.subr.bf16.mxu0 %v2293_v0  ;;  %1890 = vmatprep.subr.bf16.mxu1 %v2293_v0  ;;  %v668_v56 = vcombine.high %v648_v51, %v664_v52 }
 0x1c9   : > { %v963_v49 = vpack.c.bf16 %v665_v45, %v665_v45  ;;  %v964_v50 = vpack.c.bf16 %v666_v46, %v666_v46  ;;  %v965_v57 = vpack.c.bf16 %v667_v55, %v667_v55 }
 0x1ca   : > { %v966_v58 = vpack.c.bf16 %v668_v56, %v668_v56 }
 0x1ce   : > { %1875 = vmatmul.mubr.msk.bf16.vlgmr.msra.gmra.mxu0 %vm971_vm2, %v963_v49  ;;  %1881 = vmatmul.mubr.msk.bf16.vlgmr.msra.gmra.mxu1 %vm971_vm2, %v964_v50 }
 0x1cf   : > { %1885 = vmatpush3.bf16.xpose.msra.mxu0 %v1068_v53  ;;  %1891 = vmatpush3.bf16.xpose.msra.mxu1 %v1114_v54 }
 0x1d0   : > { %1886 = vmatprep.mubr.msk.bf16.mxu0 %vm2294_vm0, %v2293_v0  ;;  %1892 = vmatprep.mubr.msk.bf16.mxu1 %vm2294_vm0, %v2293_v0 }
 0x1d1   : > { %1896 = vmatprep.subr.bf16.mxu0 %v2293_v0  ;;  %1902 = vmatprep.subr.bf16.mxu1 %v2293_v0 }
 0x1d6   : > { %1887 = vmatmul.mubr.msk.bf16.vlgmr.msra.gmra.mxu0 %vm971_vm2, %v965_v57  ;;  %1893 = vmatmul.mubr.msk.bf16.vlgmr.msra.gmra.mxu1 %vm971_vm2, %v966_v58 }
 0x1d7   : > { %1898 = vmatprep.mubr.msk.bf16.mxu0 %vm2294_vm0, %v2293_v0  ;;  %1904 = vmatprep.mubr.msk.bf16.mxu1 %vm2294_vm0, %v2293_v0 }
 0x28e   : > { %v1012_v59 = vpop.f32.mrf.mxu0  ;;  %v1058_v60 = vpop.f32.mrf.mxu1 }
 0x28f   : > { %v1159_v61 = vsel %vm971_vm2, %v1058_v60, -inf  ;;  %v1156_v62 = vsel %vm971_vm2, %v1012_v59, -inf }
 0x290   : > { %1160 = vmax.xlane.f32.xlu1 %v1159_v61  ;;  %v1882_v63 = vpop.f32.mrf.mxu1  ;;  %1157 = vmax.xlane.f32.xlu0 %v1156_v62  ;;  %v1876_v1 = vpop.f32.mrf.mxu0 }
 0x292   : > { %v1015_v2 = vpop.f32.mrf.mxu0  ;;  %v1061_v3 = vpop.f32.mrf.mxu1 }
 0x294   : > { %v1877_v4 = vpop.f32.mrf.mxu0  ;;  %v1883_v5 = vpop.f32.mrf.mxu1 }
 0x296   : > { %v1104_v6 = vpop.f32.mrf.mxu0  ;;  %v1150_v7 = vpop.f32.mrf.mxu1 }
 0x297   : > { %v1162_v8 = vsel %vm971_vm2, %v1104_v6, -inf  ;;  %v1165_v14 = vsel %vm971_vm2, %v1150_v7, -inf }
 0x298   : > { %v1894_v9 = vpop.f32.mrf.mxu1  ;;  %1163 = vmax.xlane.f32.xlu0 %v1162_v8  ;;  %v1888_v10 = vpop.f32.mrf.mxu0 }
 0x29a   : > { %v1107_v12 = vpop.f32.mrf.mxu0  ;;  %v1153_v13 = vpop.f32.mrf.mxu1 }
 0x29c   : > { %v1895_v15 = vpop.f32.mrf.mxu1  ;;  %1166 = vmax.xlane.f32.xlu0 %v1165_v14  ;;  %v1889_v16 = vpop.f32.mrf.mxu0 }
 0x2a1   : > { %815 = vrot.lane.b32.xlu1 %v2530_v11, %s2300_s20 }
 0x319   : > { %v1161_v17 = vpop.xlane.xlu1 %1160  ;;  %v1158_v18 = vpop.xlane.xlu0 %1157 }
 0x31a   : > { %v1169_v19 = vsub.f32 %v1058_v60, %v1161_v17  ;;  %v1168_v20 = vsub.f32 %v1012_v59, %v1158_v18 }
 0x31c   : > { %v1174_v21 = vmul.f32 1.442695, %v1169_v19  ;;  %v1172_v22 = vmul.f32 1.442695, %v1168_v20 }
 0x31e   : > { %2042 = vpow2.f32 %v1174_v21 }
 0x31f   : > { %2044 = vpow2.f32 %v1172_v22 }
 0x321   : > { %v1164_v11 = vpop.xlane.xlu0 %1163 }
 0x322   : > { %v1170_v31 = vsub.f32 %v1104_v6, %v1164_v11 }
 0x324   : > { %v1176_v34 = vmul.f32 1.442695, %v1170_v31 }
 0x325   : > { %v1167_v32 = vpop.xlane.xlu0 %1166 }
 0x326   : > { %v1171_v35 = vsub.f32 %v1150_v7, %v1167_v32  ;;  %2046 = vpow2.f32 %v1176_v34 }
 0x328   : > { %v1178_v36 = vmul.f32 1.442695, %v1171_v35 }
 0x32a   : > { %2048 = vpow2.f32 %v1178_v36 }
 0x32b   : > { %v2610_v25 = vpop.eup %2042 }
 0x32c   : > { %v2612_v27 = vpop.eup %2044  ;;  %v1183_v28 = vsel %vm971_vm2, %v2610_v25, 0.0 }
 0x32d   : > { %v1180_v30 = vsel %vm971_vm2, %v2612_v27, 0.0  ;;  %1184 = vadd.xlane.f32.xlu0 %v1183_v28 }
 0x32e   : > { %1181 = vadd.xlane.f32.xlu1 %v1180_v30 }
 0x333   : > { %v2621_v37 = vpop.eup %2046 }
 0x334   : > { %v1186_v38 = vsel %vm971_vm2, %v2621_v37, 0.0 }
 0x337   : > { %v2625_v39 = vpop.eup %2048 }
 0x33f   : > { %819 = vrot.lane.b32.xlu1 %v2545_v29, %s2300_s20 }
 0x343   : > { %821 = vrot.lane.b32.xlu1 %v2535_v23, %s2300_s20  ;;  %817 = vrot.lane.b32.xlu0 %v2537_v24, %s2300_s20  ;;  %v1189_v23 = vsel %vm971_vm2, %v2625_v39, 0.0  ;;  %v816_v24 = vpop.permute.xlu1 %815 }
 0x362   : > { %1187 = vadd.xlane.f32.xlu0 %v1186_v38 }
 0x367   : > { %1190 = vadd.xlane.f32.xlu1 %v1189_v23 }
 0x3b6   : > { %v1185_v40 = vpop.xlane.xlu0 %1184 }
 0x3b7   : > { %v1182_v29 = vpop.xlane.xlu1 %1181  ;;  %2050 = vrcp.f32 %v1185_v40 }
 0x3b8   : > { %2052 = vrcp.f32 %v1182_v29 }
 0x3ba   : > { %v818_v44 = vpop.permute.xlu0 %817 }
 0x3bb   : > { %v820_v41 = vpop.permute.xlu1 %819 }
 0x3bc   : > { %v827_v42 = vcombine.low %v816_v24, %v820_v41  ;;  %v828_v43 = vcombine.high %v816_v24, %v820_v41 }
 0x3be   : > { %v835_v48 = vrot.slane %v827_v42, %v2539_v26  ;;  %v842_v49 = vrot.slane %v828_v43, %v2539_v26  ;;  %v1549_v43 = vld [vmem:[#allocation10 + $0x18] sm:$0xff] }
 0x3bf   : > { %v822_v45 = vpop.permute.xlu1 %821 }
 0x3c0   : > { %v843_v46 = vcombine.low %v818_v44, %v822_v45  ;;  %v844_v47 = vcombine.high %v818_v44, %v822_v45  ;;  %v1548_v44 = vld [vmem:[#allocation10 + $0x10] sm:$0xff] }
 0x3c2   : > { %v851_v50 = vrot.slane %v843_v46, %v2539_v26  ;;  %v858_v51 = vrot.slane %v844_v47, %v2539_v26 }
 0x3c4   : > { %v859_v52 = vcombine.low %v835_v48, %v851_v50  ;;  %v860_v53 = vcombine.high %v835_v48, %v851_v50  ;;  %v875_v54 = vcombine.low %v842_v49, %v858_v51  ;;  %v876_v55 = vcombine.high %v842_v49, %v858_v51  ;;  %v2051_v9 = vpop.eup %2050 }
 0x3c5   : > { %v2053_v10 = vpop.eup %2052  ;;  %v1197_v28 = vmul.f32 %v2051_v9, %v2610_v25  ;;  %v1546_v9 = vld [vmem:[#allocation10] sm:$0xff] }
 0x3c6   : > { %v867_v56 = vrot.slane %v859_v52, %v2551_v33  ;;  %v874_v57 = vrot.slane %v860_v53, %v2551_v33  ;;  %v883_v58 = vrot.slane %v875_v54, %v2551_v33  ;;  %v890_v59 = vrot.slane %v876_v55, %v2551_v33 }
 0x3c7   : > { %v1196_v22 = vmul.f32 %v2053_v10, %v2612_v27  ;;  %v1201_v35 = vpack.c.bf16 %v1197_v28, %v1197_v28 }
 0x3c8   : > { %v895_v60 = vcombine.low %v867_v56, %v874_v57  ;;  %v1801_v61 = vcombine.high %v867_v56, %v874_v57  ;;  %v911_v62 = vcombine.low %v883_v58, %v890_v59  ;;  %v1802_v63 = vcombine.high %v883_v58, %v890_v59 }
 0x3c9   : > { %v1200_v34 = vpack.c.bf16 %v1196_v22, %v1196_v22 }
 0x3ca   : > { %v902_v1 = vrot.slane %v895_v60, %v2539_v26  ;;  %v910_v2 = vrot.slane %v1801_v61, %v2539_v26  ;;  %v918_v3 = vrot.slane %v911_v62, %v2539_v26  ;;  %v926_v4 = vrot.slane %v1802_v63, %v2539_v26 }
 0x3cc   : > { %v927_v5 = vcombine.low %v902_v1, %v910_v2  ;;  %v943_v6 = vcombine.low %v918_v3, %v926_v4  ;;  %v928_v7 = vcombine.high %v902_v1, %v910_v2  ;;  %v944_v8 = vcombine.high %v918_v3, %v926_v4 }
 0x3ce   : > { %v935_v12 = vrot.slane %v927_v5, %v2551_v33  ;;  %v951_v13 = vrot.slane %v943_v6, %v2551_v33  ;;  %v942_v14 = vrot.slane %v928_v7, %v2551_v33  ;;  %v958_v15 = vrot.slane %v944_v8, %v2551_v33  ;;  %v1547_v8 = vld [vmem:[#allocation10 + $0x8] sm:$0xff] }
 0x3d0   : > { %v959_v16 = vcombine.low %v935_v12, %v951_v13  ;;  %v960_v17 = vcombine.high %v935_v12, %v951_v13  ;;  %v961_v18 = vcombine.low %v942_v14, %v958_v15  ;;  %v962_v19 = vcombine.high %v942_v14, %v958_v15 }
 0x3d2   : > { %v1204_v20 = vpack.c.bf16 %v959_v16, %v959_v16  ;;  %v1205_v21 = vpack.c.bf16 %v960_v17, %v960_v17  ;;  %v1206_v31 = vpack.c.bf16 %v961_v18, %v961_v18  ;;  %v1207_v32 = vpack.c.bf16 %v962_v19, %v962_v19 }
 0x3d4   : > { %v1213_v30 = vsel %vm1211_vm3, %v1204_v20, 0  ;;  %v1259_v11 = vsel %vm1211_vm3, %v1205_v21, 0  ;;  %v1305_v25 = vsel %vm1211_vm3, %v1206_v31, 0  ;;  %v1351_v27 = vsel %vm1211_vm3, %v1207_v32, 0 }
 0x3d5   : > { %1897 = vmatpush3.bf16.msra.mxu0 %v1213_v30  ;;  %1903 = vmatpush3.bf16.msra.mxu1 %v1259_v11 }
 0x3d6   : > { %1908 = vmatprep.subr.bf16.mxu0 %v2293_v0  ;;  %1914 = vmatprep.subr.bf16.mxu1 %v2293_v0 }
 0x3d8   : > { %1899 = vmatmul.mubr.msk.bf16.vlgmr.msra.gmra.mxu0 %vm971_vm2, %v1200_v34  ;;  %1905 = vmatmul.mubr.msk.bf16.vlgmr.msra.gmra.mxu1 %vm971_vm2, %v1201_v35 }
 0x3d9   : > { %1909 = vmatpush3.bf16.msra.mxu0 %v1305_v25  ;;  %1915 = vmatpush3.bf16.msra.mxu1 %v1351_v27 }
 0x3da   : > { %1910 = vmatprep.mubr.msk.bf16.mxu0 %vm2294_vm0, %v2293_v0  ;;  %1916 = vmatprep.mubr.msk.bf16.mxu1 %vm2294_vm0, %v2293_v0 }
 0x3db   : > { %1920 = vmatprep.subr.mxu0 %v2293_v0 }
 0x3eb   : > { %v1188_v36 = vpop.xlane.xlu0 %1187 }
 0x3ec   : > { %2054 = vrcp.f32 %v1188_v36 }
 0x3f0   : > { %v1191_v38 = vpop.xlane.xlu1 %1190 }
 0x3f1   : > { %2056 = vrcp.f32 %v1191_v38 }
 0x3f9   : > { %v2055_v23 = vpop.eup %2054 }
 0x3fa   : > { %v1198_v24 = vmul.f32 %v2055_v23, %v2621_v37 }
 0x3fc   : > { %v1202_v29 = vpack.c.bf16 %v1198_v24, %v1198_v24 }
 0x3fe   : > { %v2057_v40 = vpop.eup %2056  ;;  %1911 = vmatmul.mubr.msk.bf16.vlgmr.msra.gmra.mxu0 %vm971_vm2, %v1202_v29 }
 0x3ff   : > { %v1199_v41 = vmul.f32 %v2057_v40, %v2625_v39  ;;  %1928 = vmatprep.mubr.msk.f32.mxu0 %vm2294_vm0, %v2293_v0  ;;  %1921 = vmatpush3.msra.mxu0 %v1549_v43 }
 0x400   : > { %1922 = vmatprep.subr.mxu0 %v2293_v0 }
 0x401   : > { %v1203_v42 = vpack.c.bf16 %v1199_v41, %v1199_v41  ;;  %1923 = vmatpush3.msra.mxu0 %v1548_v44  ;;  %v1813_v41 = vld [vmem:[%s2743_s5] ss:$0 sm:$0xff] }
 0x402   : > { %1924 = vmatprep.subr.mxu0 %v2293_v0 }
 0x403   : > { %1917 = vmatmul.mubr.msk.bf16.vlgmr.msra.gmra.mxu1 %vm971_vm2, %v1203_v42  ;;  %1925 = vmatpush3.msra.mxu0 %v1547_v8 }
 0x404   : > { %1926 = vmatprep.subr.mxu0 %v2293_v0 }
 0x405   : > { %1927 = vmatpush3.msra.mxu0 %v1546_v9 }
 0x498   : > { %v1249_v37 = vpop.f32.mrf.mxu0  ;;  %v1295_v45 = vpop.f32.mrf.mxu1 }
 0x49a   : > { %v1900_v46 = vpop.f32.mrf.mxu0  ;;  %v1906_v47 = vpop.f32.mrf.mxu1 }
 0x49c   : > { %v1252_v48 = vpop.f32.mrf.mxu0  ;;  %v1298_v39 = vpop.f32.mrf.mxu1 }
 0x49e   : > { %v1901_v49 = vpop.f32.mrf.mxu0  ;;  %v1907_v50 = vpop.f32.mrf.mxu1 }
 0x4be   : > { %v1341_v51 = vpop.f32.mrf.mxu0 }
 0x4bf   : > { %v1393_v53 = vcombine.low %v1249_v37, %v1341_v51  ;;  %v1394_v54 = vcombine.high %v1249_v37, %v1341_v51 }
 0x4c0   : > { %v1912_v52 = vpop.f32.mrf.mxu0 }
 0x4c1   : > { %v1401_v61 = vrot.slane %v1393_v53, %v2539_v26  ;;  %v1408_v62 = vrot.slane %v1394_v54, %v2539_v26 }
 0x4c2   : > { %v1344_v55 = vpop.f32.mrf.mxu0 }
 0x4c3   : > { %v1387_v56 = vpop.f32.mrf.mxu1 }
 0x4c4   : > { %v1409_v57 = vcombine.low %v1295_v45, %v1387_v56  ;;  %v1410_v58 = vcombine.high %v1295_v45, %v1387_v56  ;;  %v1913_v59 = vpop.f32.mrf.mxu0 }
 0x4c5   : > { %v1918_v60 = vpop.f32.mrf.mxu1 }
 0x4c6   : > { %v1417_v63 = vrot.slane %v1409_v57, %v2539_v26  ;;  %v1424_v1 = vrot.slane %v1410_v58, %v2539_v26 }
 0x4c7   : > { %v1390_v2 = vpop.f32.mrf.mxu1 }
 0x4c8   : > { %v1425_v3 = vcombine.low %v1401_v61, %v1417_v63  ;;  %v1426_v4 = vcombine.high %v1401_v61, %v1417_v63  ;;  %v1441_v5 = vcombine.low %v1408_v62, %v1424_v1  ;;  %v1442_v6 = vcombine.high %v1408_v62, %v1424_v1 }
 0x4c9   : > { %v1919_v7 = vpop.f32.mrf.mxu1 }
 0x4ca   : > { %v1433_v10 = vrot.slane %v1425_v3, %v2551_v33  ;;  %v1440_v12 = vrot.slane %v1426_v4, %v2551_v33  ;;  %v1449_v13 = vrot.slane %v1441_v5, %v2551_v33  ;;  %v1456_v14 = vrot.slane %v1442_v6, %v2551_v33 }
 0x4cc   : > { %v1461_v15 = vcombine.low %v1433_v10, %v1440_v12  ;;  %v1811_v16 = vcombine.high %v1433_v10, %v1440_v12  ;;  %v1477_v17 = vcombine.low %v1449_v13, %v1456_v14  ;;  %v1812_v18 = vcombine.high %v1449_v13, %v1456_v14 }
 0x4ce   : > { %v1468_v19 = vrot.slane %v1461_v15, %v2539_v26  ;;  %v1476_v20 = vrot.slane %v1811_v16, %v2539_v26  ;;  %v1484_v21 = vrot.slane %v1477_v17, %v2539_v26  ;;  %v1492_v22 = vrot.slane %v1812_v18, %v2539_v26 }
 0x4d0   : > { %v1494_v28 = vcombine.high %v1468_v19, %v1476_v20  ;;  %v1510_v30 = vcombine.high %v1484_v21, %v1492_v22  ;;  %v1493_v11 = vcombine.low %v1468_v19, %v1476_v20  ;;  %v1509_v31 = vcombine.low %v1484_v21, %v1492_v22 }
 0x4d2   : > { %v1508_v32 = vrot.slane %v1494_v28, %v2551_v33  ;;  %v1524_v0 = vrot.slane %v1510_v30, %v2551_v33  ;;  %v1501_v34 = vrot.slane %v1493_v11, %v2551_v33  ;;  %v1517_v35 = vrot.slane %v1509_v31, %v2551_v33 }
 0x4d4   : > { %v1527_v25 = vcombine.low %v1508_v32, %v1524_v0  ;;  %v1526_v27 = vcombine.high %v1501_v34, %v1517_v35  ;;  %v1525_v36 = vcombine.low %v1501_v34, %v1517_v35  ;;  %v1528_v26 = vcombine.high %v1508_v32, %v1524_v0 }
 0x4d6   : > { %1534 = vrot.lane.b32.xlu1 %v1527_v25, %s2301_s2  ;;  %1530 = vrot.lane.b32.xlu0 %v1526_v27, %s2302_s3 }
 0x4da   : > { %1538 = vrot.lane.b32.xlu0 %v1528_v26, %s2303_s18 }
 0x548   : > { %v1531_v38 = vpop.permute.xlu0 %1530  ;;  %v1535_v23 = vpop.permute.xlu1 %1534 }
 0x549   : > { %v1541_v24 = vsel %vm971_vm2, %v1525_v36, %v1531_v38 }
 0x54a   : > { %v1543_v29 = vsel %vm1542_vm4, %v1541_v24, %v1535_v23 }
 0x54c   : > { %v1539_v33 = vpop.permute.xlu0 %1538 }
 0x54d   : > { %v1545_v40 = vsel %vm1544_vm5, %v1543_v29, %v1539_v33 }
 0x54e   : > { %1929 = vmatmul.mubr.msk.f32.vlgmr.msra.gmra.mxu0 %vm371_vm1, %v1545_v40 }
 0x60e   : > { %v1626_v42 = vpop.f32.mrf.mxu0 }
 0x60f   : > { %v1627_v43 = vadd.f32 %v1813_v41, %v1626_v42 }
 0x610   : > { %v1930_v44 = vpop.f32.mrf.mxu0 }
 0x611   : > { %1630 = vst.msk [vmem:[%s363_s0] sm:$0xff] %vm371_vm1, %v1627_v43 }
 0x612   : > { %2205 = shalt.err (!%p2202_p2)
}
 0x613   : > { %s2206_s12 = scalar_lea.hbm %s2695_s13, 128  ;;  %s2210_s2 = scalar_lea.hbm %s2744_s6, 256 }
 0x614   : > { %p2207_p4 = scmp.ne.s32.totalorder %s2695_s13, %s2206_s12  ;;  %p2211_p7 = scmp.lt.s32.totalorder %s2695_s13, %s2744_s6 }
 0x615   : > { %p2212_p6 = scmp.lt.s32.totalorder %s2210_s2, %s2206_s12 }
 0x616   : > { %p2208_p1 = pnand %p2207_p4, %p2436_p5 }
 0x617   : > { %p2213_p12 = por %p2212_p6, %p2211_p7 }
 0x618   : > { %p2209_p8 = pneg %p2208_p1 }
 0x61a   : > { %p2214_p0 = pnand %p2213_p12, %p2209_p8 }
 0x61c   : > { %2217 = shalt.err (!%p2214_p0)
}
 0x61d   : > { %1947 = dma.vmem_to_hbm [thread:$0]  (%p2436_p5), %s1647_s8, 128, %s2695_s13, %s1632_s19  }
 0x61e PF: > { %s1658_s16 = sand.u32 1, %s2264_s21   ;;  %p2767_p3 = scmp.ne.s32.totalorder %s2752_s30, 0 }
 0x61f   : > { %p2768_p10 = scmp.ge.s32.totalorder %s2284_s26, 2  ;;  %s1659_s28 = scalar_lea.sflag [#allocation4], %s1658_s16 }
 0x621   : > { %p1967_p11 = pnand %p2768_p10, %p2767_p3 }
 0x623   : > { %p1968_p9 = pneg %p1967_p11 }
 0x625   : > { %2259 = dma.done.wait (%p1968_p9), %s1659_s28, 128  }
 0x626   : > { %2261 = vsyncadd (%p1968_p9), %s1659_s28, 4294967168  ;;  %s26_s26 = sadd.s32 1, %s2284_s26   ;;  %s2769_s21 = smov %s2268_s22 }
 0x627   : > { %p23_p13 = scmp.ge.s32.totalorder %s26_s26, 4   ;;  %s2770_s22 = smov %s2272_s23 }
 0x628   : > { %s2771_s23 = smov %s2448_s17  ;;  %s2772_s24 = smov %s2280_s25 }
 0x629   : > { %s2773_s25 = smov %s2775_s15  ;;  %25 = sbr.rel (!%p23_p13) target bundleno = 14 (0xe), region = 114 }
 0x62e   :  { %1664 = vsyncpa [#allocation3], 1 }
 0x62f   :  { %1666 = vsyncpa [#allocation3 + $0x1], 1 }
 0x630   :  { %1667 = vsyncpa [#allocation6], 1 }
 0x631   :  { %1669 = vsyncpa [#allocation6 + $0x1], 1 }
 0x632   :  { %1670 = vsyncpa [#allocation9], 1 }
 0x633   :  { %1671 = vsyncpa [#allocation4], 1 }
 0x634   :  { %1673 = vsyncpa [#allocation4 + $0x1], 1 }

</bundles_post_ra>
